<compile_context>
chip_gen: v5e
topology: v5e:2x2
jax: 0.10.0
libtpu: 0.0.40
codegen_flags: <defaults>
</compile_context>

<pallas_src>
import functools

import jax
import jax.numpy as jnp
from jax.experimental import pallas as pl
from jax.experimental.pallas import tpu as pltpu


def _softplus(x):
    # Stable softplus matching torch.nn.functional.softplus(threshold=20):
    # returns x for large x; the exp argument is clamped so the untaken
    # branch of the where cannot overflow.
    return jnp.where(x > 20.0, x, jnp.log1p(jnp.exp(jnp.minimum(x, 20.0))))


def _ceil_to(x, m):
    return ((x + m - 1) // m) * m


def bayesian_linear_kernel(x_ref, wmu_ref, wrho_ref, weps_ref, b_ref,
                           o_ref, acc_ref, *, compute_dtype):
    k = pl.program_id(2)

    @pl.when(k == 0)
    def _():
        acc_ref[...] = jnp.zeros_like(acc_ref)

    # Reparameterized weight sample for this (tk, tn) tile:
    #   w = mu + softplus(rho) * eps        (done in f32 on the VPU/EUP)
    w = wmu_ref[...] + _softplus(wrho_ref[...]) * weps_ref[...]

    # x @ w feeds the MXU directly (no transpose); f32 accumulation.
    acc_ref[...] += jnp.dot(
        x_ref[...].astype(compute_dtype),
        w.astype(compute_dtype),
        preferred_element_type=jnp.float32,
    )

    @pl.when(k == pl.num_programs(2) - 1)
    def _():
        # Bias (pre-sampled in the wrapper) broadcast-added on the last step.
        o_ref[...] = (acc_ref[...] + b_ref[...]).astype(o_ref.dtype)


def bayesian_linear(x, weight_mu, weight_rho, weight_eps,
                    bias_mu, bias_rho, bias_eps,
                    *, tm=256, tn=256, tk=512, compute_dtype=jnp.float32):
    """Forward pass of BayesianLinear.

    x:            [batch, in_features]
    weight_*:     [out_features, in_features]   (PyTorch nn.Linear layout)
    bias_*:       [out_features]
    returns       [batch, out_features]
    """
    batch, in_f = x.shape
    out_f, in_f2 = weight_mu.shape
    assert in_f == in_f2

    # --- wrapper-side layout & cheap math -----------------------------------
    # Weight params as [in_f, out_f]: kernel does x @ w, output is lane-dense.
    wmu_t = weight_mu.T
    wrho_t = weight_rho.T
    weps_t = weight_eps.T

    # Bias reparameterization is O(out_f); XLA fuses it for free.
    bias = (bias_mu + _softplus(bias_rho) * bias_eps).reshape(1, out_f)
    bias = bias.astype(jnp.float32)

    # --- tiling / padding ----------------------------------------------------
    # Respect (8, 128) layout: pad dims up, clamp tiles to the padded dims,
    # then re-pad dims to a multiple of the tile.
    Mp = _ceil_to(batch, 8)
    Kp = _ceil_to(in_f, 128)
    Np = _ceil_to(out_f, 128)
    tm = min(tm, Mp)
    tk = min(tk, Kp)
    tn = min(tn, Np)
    Mp = _ceil_to(Mp, tm)
    Kp = _ceil_to(Kp, tk)
    Np = _ceil_to(Np, tn)

    # Zero padding is exact: padded eps == 0 -> padded sampled weight == 0,
    # padded x columns == 0 -> no contribution to the accumulator.
    x_p = jnp.pad(x, ((0, Mp - batch), (0, Kp - in_f)))
    wmu_p = jnp.pad(wmu_t, ((0, Kp - in_f), (0, Np - out_f)))
    wrho_p = jnp.pad(wrho_t, ((0, Kp - in_f), (0, Np - out_f)))
    weps_p = jnp.pad(weps_t, ((0, Kp - in_f), (0, Np - out_f)))
    bias_p = jnp.pad(bias, ((0, 0), (0, Np - out_f)))

    grid = (Mp // tm, Np // tn, Kp // tk)

    kernel = functools.partial(bayesian_linear_kernel,
                               compute_dtype=compute_dtype)

    out_p = pl.pallas_call(
        kernel,
        out_shape=jax.ShapeDtypeStruct((Mp, Np), x.dtype),
        grid_spec=pltpu.PrefetchScalarGridSpec(
            num_scalar_prefetch=0,
            grid=grid,
            in_specs=[
                pl.BlockSpec((tm, tk), lambda i, j, k: (i, k)),   # x
                pl.BlockSpec((tk, tn), lambda i, j, k: (k, j)),   # weight_mu^T
                pl.BlockSpec((tk, tn), lambda i, j, k: (k, j)),   # weight_rho^T
                pl.BlockSpec((tk, tn), lambda i, j, k: (k, j)),   # weight_eps^T
                pl.BlockSpec((1, tn), lambda i, j, k: (0, j)),    # sampled bias
            ],
            out_specs=pl.BlockSpec((tm, tn), lambda i, j, k: (i, j)),
            scratch_shapes=[pltpu.VMEM((tm, tn), jnp.float32)],
        ),
        compiler_params=pltpu.CompilerParams(
            dimension_semantics=("parallel", "parallel", "arbitrary")),
    )(x_p, wmu_p, wrho_p, weps_p, bias_p)

    return out_p[:batch, :out_f]


if __name__ == "__main__":
    key = jax.random.PRNGKey(0)
    k_x, k_wmu, k_wrho, k_bmu, k_brho, k_weps, k_beps = jax.random.split(key, 7)

    # Small but non-trivial shapes so the (i, j, k) grid (incl. the k
    # reduction accumulator) actually gets exercised with tm=8, tn=128, tk=128.
    batch, in_features, out_features = 16, 256, 128

    x = jax.random.normal(k_x, (batch, in_features), dtype=jnp.float32)

    # Deterministic "parameters" (module __init__ uses torch.randn for all).
    weight_mu = jax.random.normal(k_wmu, (out_features, in_features), jnp.float32)
    weight_rho = jax.random.normal(k_wrho, (out_features, in_features), jnp.float32)
    bias_mu = jax.random.normal(k_bmu, (out_features,), jnp.float32)
    bias_rho = jax.random.normal(k_brho, (out_features,), jnp.float32)

    # Epsilon samples (torch.randn_like equivalents), drawn once per forward.
    weight_eps = jax.random.normal(k_weps, (out_features, in_features), jnp.float32)
    bias_eps = jax.random.normal(k_beps, (out_features,), jnp.float32)

    out = bayesian_linear(x, weight_mu, weight_rho, weight_eps,
                          bias_mu, bias_rho, bias_eps,
                          tm=8, tn=128, tk=128)
    out = jax.block_until_ready(out)

    # Pure-JAX reference (same stable softplus; identical to log1p(exp(.))
    # for the N(0,1)-scale rho used here).
    w_ref = weight_mu + _softplus(weight_rho) * weight_eps
    b_ref = bias_mu + _softplus(bias_rho) * bias_eps
    ref = jnp.dot(x, w_ref.T, preferred_element_type=jnp.float32) + b_ref

    assert out.shape == (batch, out_features)
    assert jnp.allclose(out, ref, atol=1e-4, rtol=1e-4), (
        float(jnp.max(jnp.abs(out - ref))))

    print("KERNEL_OK")
</pallas_src>

<mosaic_0001>
module attributes {stable_mosaic.version = 11 : i64} {
  func.func @bayesian_linear_kernel(%arg0: i32, %arg1: i32, %arg2: i32, %arg3: memref<8x128xf32, #tpu.memory_space<vmem>>, %arg4: memref<128x128xf32, #tpu.memory_space<vmem>>, %arg5: memref<128x128xf32, #tpu.memory_space<vmem>>, %arg6: memref<128x128xf32, #tpu.memory_space<vmem>>, %arg7: memref<1x128xf32, #tpu.memory_space<vmem>>, %arg8: memref<8x128xf32, #tpu.memory_space<vmem>>, %arg9: memref<8x128xf32, #tpu.memory_space<vmem>>) attributes {dimension_semantics = [#tpu.dimension_semantics<parallel>, #tpu.dimension_semantics<parallel>, #tpu.dimension_semantics<arbitrary>], iteration_bounds = array<i64: 2, 1, 2>, scalar_prefetch = 0 : i64, scratch_operands = 1 : i64, tpu.core_type = #tpu.core_type<tc>, window_params = [{transform_indices = @transform_0, window_bounds = array<i64: 8, 128>}, {transform_indices = @transform_1, window_bounds = array<i64: 128, 128>}, {transform_indices = @transform_2, window_bounds = array<i64: 128, 128>}, {transform_indices = @transform_3, window_bounds = array<i64: 128, 128>}, {transform_indices = @transform_4, window_bounds = array<i64: 1, 128>}, {transform_indices = @transform_5, window_bounds = array<i64: 8, 128>}]} {
    %c0_i32 = arith.constant 0 : i32
    %0 = arith.cmpi eq, %arg2, %c0_i32 : i32
    %1 = arith.extui %0 : i1 to i32
    %c0_i32_0 = arith.constant 0 : i32
    %2 = arith.cmpi ne, %1, %c0_i32_0 : i32
    scf.if %2 {
      %cst_15 = arith.constant 0.000000e+00 : f32
      %23 = vector.broadcast %cst_15 : f32 to vector<8x128xf32>
      %c0_16 = arith.constant 0 : index
      %c0_17 = arith.constant 0 : index
      %24 = vector.load %arg9[%c0_16, %c0_17] : memref<8x128xf32, #tpu.memory_space<vmem>>, vector<8x128xf32>
      tpu.vector_store %arg9[%c0_16, %c0_17], %23 {strides = array<i32>} : memref<8x128xf32, #tpu.memory_space<vmem>>, vector<8x128xf32>,
    } else {
    }
    %c0 = arith.constant 0 : index
    %c0_1 = arith.constant 0 : index
    %3 = vector.load %arg4[%c0, %c0_1] : memref<128x128xf32, #tpu.memory_space<vmem>>, vector<128x128xf32>
    %c0_2 = arith.constant 0 : index
    %c0_3 = arith.constant 0 : index
    %4 = vector.load %arg5[%c0_2, %c0_3] : memref<128x128xf32, #tpu.memory_space<vmem>>, vector<128x128xf32>
    %cst = arith.constant 2.000000e+01 : f32
    %5 = vector.broadcast %cst : f32 to vector<128x128xf32>
    %6 = arith.cmpf ogt, %4, %5 : vector<128x128xf32>
    %cst_4 = arith.constant 2.000000e+01 : f32
    %7 = vector.broadcast %cst_4 : f32 to vector<128x128xf32>
    %8 = arith.minimumf %4, %7 : vector<128x128xf32>
    %9 = math.exp %8 : vector<128x128xf32>
    %10 = math.log1p %9 : vector<128x128xf32>
    %11 = arith.select %6, %4, %10 : vector<128x128xi1>, vector<128x128xf32>
    %c0_5 = arith.constant 0 : index
    %c0_6 = arith.constant 0 : index
    %12 = vector.load %arg6[%c0_5, %c0_6] : memref<128x128xf32, #tpu.memory_space<vmem>>, vector<128x128xf32>
    %13 = arith.mulf %11, %12 : vector<128x128xf32>
    %14 = arith.addf %3, %13 : vector<128x128xf32>
    %c0_7 = arith.constant 0 : index
    %c0_8 = arith.constant 0 : index
    %15 = vector.load %arg9[%c0_7, %c0_8] : memref<8x128xf32, #tpu.memory_space<vmem>>, vector<8x128xf32>
    %c0_9 = arith.constant 0 : index
    %c0_10 = arith.constant 0 : index
    %16 = vector.load %arg3[%c0_9, %c0_10] : memref<8x128xf32, #tpu.memory_space<vmem>>, vector<8x128xf32>
    %cst_11 = arith.constant dense<0.000000e+00> : vector<8x128xf32>
    %17 = tpu.matmul %16, %14, %cst_11 {dimension_numbers = #tpu.dot_dimension_numbers<[1], [0], [0], [1], [0, 0, 1, 1], [], []>} : vector<8x128xf32>, vector<128x128xf32>, vector<8x128xf32> -> vector<8x128xf32>
    %18 = arith.addf %15, %17 : vector<8x128xf32>
    %c0_12 = arith.constant 0 : index
    %c0_13 = arith.constant 0 : index
    %19 = vector.load %arg9[%c0_12, %c0_13] : memref<8x128xf32, #tpu.memory_space<vmem>>, vector<8x128xf32>
    tpu.vector_store %arg9[%c0_12, %c0_13], %18 {strides = array<i32>} : memref<8x128xf32, #tpu.memory_space<vmem>>, vector<8x128xf32>,
    %c1_i32 = arith.constant 1 : i32
    %20 = arith.cmpi eq, %arg2, %c1_i32 : i32
    %21 = arith.extui %20 : i1 to i32
    %c0_i32_14 = arith.constant 0 : i32
    %22 = arith.cmpi ne, %21, %c0_i32_14 : i32
    scf.if %22 {
      %c0_15 = arith.constant 0 : index
      %c0_16 = arith.constant 0 : index
      %23 = vector.load %arg9[%c0_15, %c0_16] : memref<8x128xf32, #tpu.memory_space<vmem>>, vector<8x128xf32>
      %c0_17 = arith.constant 0 : index
      %c0_18 = arith.constant 0 : index
      %24 = vector.load %arg7[%c0_17, %c0_18] : memref<1x128xf32, #tpu.memory_space<vmem>>, vector<1x128xf32>
      %25 = vector.broadcast %24 : vector<1x128xf32> to vector<8x128xf32>
      %26 = arith.addf %23, %25 : vector<8x128xf32>
      %c0_19 = arith.constant 0 : index
      %c0_20 = arith.constant 0 : index
      %27 = vector.load %arg8[%c0_19, %c0_20] : memref<8x128xf32, #tpu.memory_space<vmem>>, vector<8x128xf32>
      tpu.vector_store %arg8[%c0_19, %c0_20], %26 {strides = array<i32>} : memref<8x128xf32, #tpu.memory_space<vmem>>, vector<8x128xf32>,
    } else {
    }
    return
  }
  func.func @transform_0(%arg0: i32, %arg1: i32, %arg2: i32) -> (i32, i32) {
    %c0_i32 = arith.constant 0 : i32
    return %arg0, %arg2 : i32, i32
  }
  func.func @transform_1(%arg0: i32, %arg1: i32, %arg2: i32) -> (i32, i32) {
    %c0_i32 = arith.constant 0 : i32
    return %arg2, %arg1 : i32, i32
  }
  func.func @transform_2(%arg0: i32, %arg1: i32, %arg2: i32) -> (i32, i32) {
    %c0_i32 = arith.constant 0 : i32
    return %arg2, %arg1 : i32, i32
  }
  func.func @transform_3(%arg0: i32, %arg1: i32, %arg2: i32) -> (i32, i32) {
    %c0_i32 = arith.constant 0 : i32
    return %arg2, %arg1 : i32, i32
  }
  func.func @transform_4(%arg0: i32, %arg1: i32, %arg2: i32) -> (i32, i32) {
    %c0_i32 = arith.constant 0 : i32
    %c0_i32_0 = arith.constant 0 : i32
    return %c0_i32, %arg1 : i32, i32
  }
  func.func @transform_5(%arg0: i32, %arg1: i32, %arg2: i32) -> (i32, i32) {
    %c0_i32 = arith.constant 0 : i32
    return %arg0, %arg1 : i32, i32
  }
}

</mosaic_0001>

<bundles_post_ra>
// kernel: tpu_custom_call.1
= control target key start
LH: loop header
LB: loop body
LE: loop exit
PB: predicated region body
PF: predicated region fallthrough
CT: control target
= control target key end

     0   :  { %s2073_s0 = inlined_call_operand.hbm [shape: f32[16,256], index: 0, kind: input, shape index: {}]   ;;  %s2074_s1 = inlined_call_operand.hbm [shape: f32[256,128], index: 1, kind: input, shape index: {}]   ;;  %s2075_s2 = inlined_call_operand.hbm [shape: f32[256,128], index: 2, kind: input, shape index: {}]   ;;  %s2076_s3 = inlined_call_operand.hbm [shape: f32[256,128], index: 3, kind: input, shape index: {}]   ;;  %s2077_s4 = inlined_call_operand.vmem [shape: f32[1,128], index: 4, kind: input, shape index: {}]   ;;  %s2078_s5 = inlined_call_operand.hbm [shape: f32[16,128], index: 5, kind: output, shape index: {}]  }
   0x1   :  { %2096 = sst [smem:[#allocation30_spill]] %s2074_s1 }
   0x2   :  { %2097 = sst [smem:[#allocation31_spill]] %s2077_s4 }
   0x3   :  { %2098 = sst [smem:[#allocation32_spill]] %s2078_s5 }
   0x4   :  { %10 = vsyncpa [#allocation4], 0 }
   0x5   :  { %12 = vsyncpa [#allocation4 + $0x1], 0 }
   0x6   :  { %13 = vsyncpa [#allocation7], 0 }
   0x7   :  { %15 = vsyncpa [#allocation7 + $0x1], 0 }
   0x8   :  { %16 = vsyncpa [#allocation10], 0 }
   0x9   :  { %18 = vsyncpa [#allocation10 + $0x1], 0 }
   0xa   :  { %19 = vsyncpa [#allocation5], 0 }
   0xb   :  { %21 = vsyncpa [#allocation5 + $0x1], 0  ;;  %s1498_s18 = smov 0   ;;  %s1500_s19 = smov 0  }
   0xc   :  { %s1502_s20 = smov 0   ;;  %s1504_s21 = smov 0  }
   0xd   :  { %s1506_s22 = smov 0   ;;  %s1508_s23 = smov 0  }
   0xe   :  { %s1510_s24 = smov 0   ;;  %s1512_s25 = smov 0  }
   0xf   :  { %s1514_s26 = smov 0   ;;  %s1516_s27 = smov 0  }
  0x10   :  { %s1518_s28 = smov 0   ;;  %s1520_s29 = smov 0  }
  0x11   :  { %s1522_s30 = smov 0   ;;  %s1524_s6 = smov 0  }
  0x12 LB: > { %2099 = sst [smem:[#allocation16_spill]] %s1419_s20  ;;  %p63_p0 = scmp.eq.s32.totalorder %s1463_s6, 0  ;;  %s1463_s6 = sphi %s1524_s6, %s27_s6   ;;  %s1459_s30 = sphi %s1522_s30, %s2184_s30   ;;  %s1455_s29 = sphi %s1520_s29, %s2183_s29   ;;  %s1451_s28 = sphi %s1518_s28, %s2182_s28   ;;  %s1447_s27 = sphi %s1516_s27, %s2181_s27   ;;  %s1443_s26 = sphi %s1514_s26, %s2169_s26   ;;  %s1439_s25 = sphi %s1512_s25, %s2180_s25   ;;  %s1435_s24 = sphi %s1510_s24, %s2179_s24   ;;  %s1431_s23 = sphi %s1508_s23, %s2178_s23   ;;  %s1427_s22 = sphi %s1506_s22, %s2177_s22   ;;  %s1423_s21 = sphi %s1504_s21, %s2166_s21   ;;  %s1419_s20 = sphi %s1502_s20, %s2165_s20   ;;  %s1415_s19 = sphi %s1500_s19, %s2176_s19   ;;  %s1411_s18 = sphi %s1498_s18, %s2175_s18  }
  0x13   : > { %2100 = sst [smem:[#allocation17_spill]] %s1427_s22  ;;  %p90_p1 = scmp.ne.s32.totalorder %s1431_s23, %s1427_s22 }
  0x14   : > { %2101 = sst [smem:[#allocation18_spill]] %s1443_s26  ;;  %p2090_p2 = scmp.lt.s32.totalorder %s1463_s6, 4 }
  0x15   : > { %2102 = sst [smem:[#allocation19_spill]] %s1447_s27  ;;  %s257_s8 = sand.u32 1, %s1463_s6  }
  0x16   : > { %2103 = sst [smem:[#allocation20_spill]] %s1451_s28  ;;  %p92_p3 = por %p90_p1, %p63_p0 }
  0x17   : > { %2104 = sst [smem:[#allocation21_spill]] %s1455_s29  ;;  %s2079_s9 = sand.u32 1, %s1431_s23  }
  0x18   : > { %2105 = sst [smem:[#allocation22_spill]] %s1459_s30  ;;  %s1578_s10 = sshll.u32 %s1455_s29, 7 }
  0x19   : > { %s1582_s11 = sshll.u32 %s2079_s9, 7  ;;  %s2106_s1 = sld [smem:[#allocation30_spill]] }
  0x1a   : > { %s261_s16 = scalar_lea.vmem [#allocation6], %s1582_s11  ;;  %p1591_p4 = pnand %p2090_p2, %p92_p3 }
  0x1b   : > { %s270_s17 = sshll.u32 %s261_s16, 4  ;;  %p965_p5 = scmp.ge.s32.totalorder %s1463_s6, 1  ;;  %s271_s17 = int_to_ptr.vmem [resolvable:$true] %s270_s17 }
  0x1c   : > { %s1596_s12 = scalar_lea.sflag [#allocation7], %s257_s8  ;;  %s2081_s13 = smov 128  }
  0x1d   : > { %p324_p6 = scmp.lt.s32.totalorder %s1463_s6, 5  ;;  %s1610_s7 = sadd.s32 4294967295, %s1463_s6  }
  0x1e   : > { %s46_s5 = sadd.s32 1, %s1459_s30  ;;  %s55_s28 = sadd.s32 1, %s1443_s26 }
  0x1f   : > { %s267_s14 = scalar_lea.hbm %s2106_s1, %s1578_s10  ;;  %p1605_p7 = pnand %p965_p5, %p324_p6 }
  0x20   : > { %s268_s15 = sshll.u32 %s267_s14, 4  ;;  %s2083_s14 = smov 8   ;;  %s269_s15 = int_to_ptr.hbm [resolvable:$true] %s268_s15 }
  0x21   : > { %996 = dma.hbm_to_vmem [thread:$0]  (!%p1591_p4), %s269_s15, 2048, %s271_s17, %s1596_s12, %s2081_s13, %s2081_s13, %s2083_s14  }
  0x22   : > { %s39_s1 = sadd.s32 1, %s1455_s29  ;;  %p62_p9 = scmp.ne.s32.totalorder %s1443_s26, %s1439_s25 }
  0x23   : > { %p40_p8 = scmp.ge.s32.totalorder %s39_s1, 2  ;;  %p68_p10 = scmp.ne.s32.totalorder %s1439_s25, %s1435_s24 }
  0x24   : > { %p1627_p11 = por %p63_p0, %p62_p9  ;;  %p69_p13 = scmp.eq.s32.totalorder %s1610_s7, 0 }
  0x25   : > { %s2186_s1 = smov (%p40_p8, %s39_s1), 0  ;;  %s2188_s5 = smov (!%p40_p8, %s46_s5), %s1459_s30 }
  0x26   : > { %2109 = sst [smem:[#allocation23_spill]] %s2186_s1  ;;  %s51_s15 = ssub.s32 %s1455_s29, %s2186_s1 }
  0x27   : > { %p48_p12 = scmp.ge.s32.totalorder %s2188_s5, 2  ;;  %p81_p1 = scmp.eq.s32.totalorder %s51_s15, 0 }
  0x28   : > { %p96_p3 = scmp.ne.s32.totalorder %s1427_s22, %s1423_s21  ;;  %p1636_p5 = por %p69_p13, %p68_p10 }
  0x29   : > { %s2190_s5 = smov (%p48_p12, %s2188_s5), 0  ;;  %s193_s8 = sadd.s32 1, %s1419_s20 }
  0x2a   : > { %2111 = sst [smem:[#allocation24_spill]] %s2190_s5  ;;  %p1640_p0 = por %p96_p3, %p69_p13 }
  0x2b   : > { %s50_s14 = ssub.s32 %s1459_s30, %s2190_s5  ;;  %p203_p9 = scmp.ne.s32.totalorder %s1419_s20, %s1415_s19 }
  0x2c   : > { %s2113_s13 = scalar_select %p1640_p0, 1, 0 }
  0x2d   : > { %s52_s1 = sor.u32 %s51_s15, %s50_s14  ;;  %p191_p6 = scmp.eq.s32.totalorder %s50_s14, 0 }
  0x2e   : > { %2114 = sst [smem:[#allocation25_spill]] %s2113_s13  ;;  %p53_p8 = scmp.eq.s32.totalorder %s52_s1, 0 }
  0x2f   : > { %s2115_s21 = sadd.s32 1, %s1431_s23  ;;  %p204_p10 = scmp.eq.s32.totalorder %s1610_s7, 3 }
  0x30   : > { %s1652_s4 = scalar_select %p81_p1, %s1431_s23, %s2115_s21  }
  0x31   : > { %s1655_s27 = scalar_select %p53_p8, %s1443_s26, %s55_s28  }
  0x32   : > { %2116 = sst [smem:[#allocation26_spill]] %s1652_s4  ;;  %p209_p12 = scmp.ne.s32.totalorder %s1415_s19, %s1411_s18 }
  0x33   : > { %2117 = sst [smem:[#allocation27_spill]] %s1655_s27  ;;  %s2119_s13 = sadd.s32 4294967294, %s1463_s6  }
  0x34   : > { %s1658_s22 = scalar_select %p191_p6, %s1419_s20, %s193_s8  }
  0x35   : > { %p210_p13 = scmp.eq.s32.totalorder %s2119_s13, 3  ;;  %s236_s5 = sand.u32 1, %s1443_s26  }
  0x36   : > { %2118 = sst [smem:[#allocation28_spill]] %s1658_s22  ;;  %p1666_p3 = por %p204_p10, %p203_p9 }
  0x37   : > { %p1670_p2 = por %p210_p13, %p209_p12  ;;  %s953_s28 = sshll.u32 %s236_s5, 3 }
  0x38   : > { %s954_s14 = sshll.u32 %s1459_s30, 1  ;;  %s240_s8 = scalar_lea.vmem [#allocation3], %s953_s28 }
  0x39   : > { %s2121_s1 = scalar_select %p1670_p2, 1, 0 }
  0x3a   : > { %s244_s21 = sadd.s32 %s1455_s29, %s954_s14  ;;  %s250_s27 = sshll.u32 %s240_s8, 4  ;;  %s251_s27 = int_to_ptr.vmem [resolvable:$true] %s250_s27 }
  0x3b   : > { %2122 = sst [smem:[#allocation29_spill]] %s2121_s1  ;;  %s955_s13 = sshll.u32 %s244_s21, 3 }
  0x3c   : > { %s246_s22 = scalar_lea.hbm %s2073_s0, %s955_s13  ;;  %p2123_p1 = scmp.lt.s32.totalorder %s1463_s6, 4 }
  0x3d   : > { %s248_s20 = sshll.u32 %s246_s22, 4  ;;  %s237_s30 = scalar_lea.sflag [#allocation4], %s236_s5  ;;  %s249_s20 = int_to_ptr.hbm [resolvable:$true] %s248_s20 }
  0x3e   : > { %p991_p6 = pnand %p2123_p1, %p1627_p11  ;;  %s290_s8 = scalar_lea.hbm %s2075_s2, %s1578_s10 }
  0x3f   : > { %s284_s21 = scalar_lea.vmem [#allocation8], %s1582_s11  ;;  %s291_s1 = sshll.u32 %s290_s8, 4  ;;  %s292_s1 = int_to_ptr.hbm [resolvable:$true] %s291_s1 }
  0x40   : > { %993 = dma.hbm_to_vmem [thread:$0]  (!%p991_p6), %s249_s20, 128, %s251_s27, %s237_s30  }
  0x41   : > { %s293_s29 = sshll.u32 %s284_s21, 4  ;;  %s2124_s4 = smov 8   ;;  %s294_s29 = int_to_ptr.vmem [resolvable:$true] %s293_s29 }
  0x42   : > { %s2125_s26 = smov 128   ;;  %s313_s5 = scalar_lea.hbm %s2076_s3, %s1578_s10 }
  0x43   : > { %999 = dma.hbm_to_vmem [thread:$0]  (!%p1591_p4), %s292_s1, 2048, %s294_s29, %s1596_s12, %s2125_s26, %s2125_s26, %s2124_s4  }
  0x44   : > { %s314_s13 = sshll.u32 %s313_s5, 4  ;;  %s307_s20 = scalar_lea.vmem [#allocation9], %s1582_s11  ;;  %s315_s13 = int_to_ptr.hbm [resolvable:$true] %s314_s13 }
  0x45   : > { %s316_s27 = sshll.u32 %s307_s20, 4  ;;  %s2126_s30 = sand.u32 1, %s1431_s23   ;;  %s317_s27 = int_to_ptr.vmem [resolvable:$true] %s316_s27 }
  0x46   : > { %s304_s28 = scalar_lea.sflag [#allocation10], %s2126_s30  ;;  %328 = sbr.rel (%p1605_p7) target bundleno = 342 (0x156), region = 40 }
  0x47   : > { %1002 = dma.hbm_to_vmem [thread:$0]  (!%p1591_p4), %s315_s13, 2048, %s317_s27, %s304_s28, %s2125_s26, %s2125_s26, %s2124_s4  }
  0x48   : > { %s330_s29 = sand.u32 (!%p1605_p7), 1, %s1439_s25  }
  0x49   : > { %s1709_s12 = sshll.u32 (!%p1605_p7), %s330_s29, 3  ;;  %s331_s10 = scalar_lea.sflag (!%p1605_p7), [#allocation4], %s330_s29 }
  0x4a   : > { %s334_s11 = scalar_lea.vmem (!%p1605_p7), [#allocation3], %s1709_s12 }
  0x4b   : > { %1394 = dma.done.wait (%p1636_p5), %s331_s10, 128  }
  0x4c   : > { %1396 = vsyncadd (%p1636_p5), %s331_s10, 4294967168  ;;  %s2127_s9 = sld [smem:[#allocation17_spill]]  ;;  %s340_s14 = sand.u32 1, %s1610_s7  }
  0x4d   : > { %s341_s21 = scalar_lea.sflag [#allocation7], %s340_s14 }
  0x52   : > { %s342_s8 = sand.u32 1, %s2127_s9  }
  0x53   : > { %s967_s16 = sshll.u32 %s342_s8, 7 }
  0x54   : > { %s1718_s4 = scalar_lea.vmem [#allocation6], %s967_s16 }
  0x55   : > { %1398 = dma.done.wait (%p1640_p0), %s341_s21, 4096  }
  0x56   : > { %1400 = vsyncadd (%p1640_p0), %s341_s21, 4294963200  ;;  %s1724_s26 = scalar_lea.vmem [#allocation8], %s967_s16  ;;  %s361_s22 = scalar_lea.sflag [#allocation10], %s342_s8 }
  0x57   : > { %s1726_s24 = scalar_lea.vmem [#allocation9], %s967_s16 }
  0x58   : > { %1402 = dma.done.wait (%p1640_p0), %s361_s22, 2048  }
  0x59   : > { %1404 = vsyncadd (%p1640_p0), %s361_s22, 4294965248  ;;  %s407_s7 = sand.u32 1, %s1415_s19   ;;  %s2129_s13 = sld [smem:[#allocation19_spill]] }
  0x5a   : > { %s1735_s17 = sshll.u32 %s407_s7, 3 }
  0x5b   : > { %s409_s5 = scalar_lea.vmem [#allocation11], %s1735_s17 }
  0x5f   : > { %p971_p4 = scmp.ne.s32.totalorder %s2129_s13, 0 }
  0x61   : > { %419 = sbr.rel (%p971_p4) target bundleno = 104 (0x68), region = 60 }
  0x66   : > { %v1467_v0 = vmov 0.0  }
  0x67   : > { %420 = vst [vmem:[#allocation2] sm:$0xff] %v1467_v0 }
  0x68 PF: > { %v1740_v1 = vld [vmem:[%s1724_s26 + $0x78] sm:$0xff]  ;;  %v1744_v3 = vld [vmem:[%s1724_s26 + $0x70] sm:$0xff]  ;;  %v1748_v5 = vld [vmem:[%s1724_s26 + $0x68] sm:$0xff]  ;;  %s2158_s20 = sld [smem:[#allocation19_spill]] }
  0x69   : > { %v484_v2 = vmin.f32 %v1740_v1, 20.0  ;;  %v483_v4 = vmin.f32 %v1744_v3, 20.0  ;;  %v482_v7 = vmin.f32 %v1748_v5, 20.0  ;;  %v1752_v8 = vld [vmem:[%s1724_s26 + $0x60] sm:$0xff]  ;;  %v1756_v12 = vld [vmem:[%s1724_s26 + $0x58] sm:$0xff]  ;;  %v1760_v15 = vld [vmem:[%s1724_s26 + $0x50] sm:$0xff] }
  0x6a   : > { %v481_v10 = vmin.f32 %v1752_v8, 20.0  ;;  %v480_v14 = vmin.f32 %v1756_v12, 20.0  ;;  %v479_v16 = vmin.f32 %v1760_v15, 20.0  ;;  %v1764_v17 = vld [vmem:[%s1724_s26 + $0x48] sm:$0xff]  ;;  %v1768_v20 = vld [vmem:[%s1724_s26 + $0x40] sm:$0xff]  ;;  %v1772_v23 = vld [vmem:[%s1724_s26 + $0x38] sm:$0xff] }
  0x6b   : > { %v515_v6 = vmul.f32 1.442695, %v484_v2  ;;  %v513_v9 = vmul.f32 1.442695, %v483_v4  ;;  %v511_v11 = vmul.f32 1.442695, %v482_v7 }
  0x6c   : > { %v509_v13 = vmul.f32 1.442695, %v481_v10  ;;  %v507_v18 = vmul.f32 1.442695, %v480_v14  ;;  %v478_v19 = vmin.f32 %v1764_v17, 20.0  ;;  %v477_v22 = vmin.f32 %v1768_v20, 20.0 }
  0x6d   : > { %1124 = vpow2.f32 %v515_v6  ;;  %v505_v21 = vmul.f32 1.442695, %v479_v16  ;;  %v476_v27 = vmin.f32 %v1772_v23, 20.0  ;;  %v1776_v28 = vld [vmem:[%s1724_s26 + $0x30] sm:$0xff]  ;;  %vm468_vm0 = vcmp.gt.f32.partialorder %v1740_v1, 20.0 }
  0x6e   : > { %1126 = vpow2.f32 %v513_v9  ;;  %v503_v24 = vmul.f32 1.442695, %v478_v19  ;;  %v501_v26 = vmul.f32 1.442695, %v477_v22  ;;  %vm467_vm1 = vcmp.gt.f32.partialorder %v1744_v3, 20.0  ;;  %p972_p7 = scmp.ne.s32.totalorder %s2158_s20, 1 }
  0x6f   : > { %1128 = vpow2.f32 %v511_v11  ;;  %v475_v40 = vmin.f32 %v1776_v28, 20.0  ;;  %vm466_vm3 = vcmp.gt.f32.partialorder %v1748_v5, 20.0  ;;  %vm465_vm5 = vcmp.gt.f32.partialorder %v1752_v8, 20.0  ;;  %s2159_s28 = sld [smem:[#allocation31_spill]] (!%p972_p7) }
  0x70   : > { %1130 = vpow2.f32 %v509_v13  ;;  %vm464_vm7 = vcmp.gt.f32.partialorder %v1756_v12, 20.0  ;;  %vm463_vm10 = vcmp.gt.f32.partialorder %v1760_v15, 20.0  ;;  %v692_v13 = vld [vmem:[%s1726_s24 + $0x78] sm:$0xff]  ;;  %vm462_vm11 = vcmp.gt.f32.partialorder %v1764_v17, 20.0 }
  0x71   : > { %1132 = vpow2.f32 %v507_v18  ;;  %vm461_vm15 = vcmp.gt.f32.partialorder %v1768_v20, 20.0 }
  0x72   : > { %1134 = vpow2.f32 %v505_v21  ;;  %v691_v21 = vld [vmem:[%s1726_s24 + $0x70] sm:$0xff] }
  0x73   : > { %v1125_v25 = vpop.eup %1124  ;;  %1136 = vpow2.f32 %v503_v24 }
  0x74   : > { %v1127_v29 = vpop.eup %1126  ;;  %v652_v30 = vadd.f32 1.0, %v1125_v25  ;;  %v655_v31 = vmul.f32 -0.5, %v1125_v25  ;;  %v658_v32 = vand.u32 2147483647, %v1125_v25  ;;  %1138 = vpow2.f32 %v501_v26 }
  0x75   : > { %v1129_v33 = vpop.eup %1128  ;;  %v643_v34 = vadd.f32 1.0, %v1127_v29  ;;  %v646_v35 = vmul.f32 -0.5, %v1127_v29  ;;  %v649_v36 = vand.u32 2147483647, %v1127_v29 }
  0x76   : > { %v1131_v37 = vpop.eup %1130  ;;  %1140 = vlog2.f32 %v652_v30  ;;  %v656_v38 = vadd.f32 1.0, %v655_v31  ;;  %v634_v39 = vadd.f32 1.0, %v1129_v33  ;;  %vm1781_vm2 = vcmp.lt.f32.partialorder %v658_v32, 0.0004427343  ;;  %v690_v32 = vld [vmem:[%s1726_s24 + $0x68] sm:$0xff] }
  0x77   : > { %1142 = vlog2.f32 %v643_v34  ;;  %v647_v42 = vadd.f32 1.0, %v646_v35  ;;  %v637_v43 = vmul.f32 -0.5, %v1129_v33  ;;  %v1133_v44 = vpop.eup %1132  ;;  %vm1786_vm4 = vcmp.lt.f32.partialorder %v649_v36, 0.0004427343  ;;  %v435_v36 = vld [vmem:[%s1718_s4 + $0x70] sm:$0xff] }
  0x78   : > { %1144 = vlog2.f32 %v634_v39  ;;  %v640_v46 = vand.u32 2147483647, %v1129_v33  ;;  %v625_v47 = vadd.f32 1.0, %v1131_v37  ;;  %v1790_v48 = vpop.eup %1134  ;;  %v657_v49 = vmul.f32 %v1125_v25, %v656_v38 }
  0x79   : > { %v638_v50 = vadd.f32 1.0, %v637_v43  ;;  %v628_v51 = vmul.f32 -0.5, %v1131_v37  ;;  %v631_v52 = vand.u32 2147483647, %v1131_v37  ;;  %v1793_v53 = vpop.eup %1136  ;;  %v648_v54 = vmul.f32 %v1127_v29, %v647_v42  ;;  %v436_v29 = vld [vmem:[%s1718_s4 + $0x78] sm:$0xff]  ;;  %v434_v42 = vld [vmem:[%s1718_s4 + $0x68] sm:$0xff] }
  0x7a   : > { %1146 = vlog2.f32 %v625_v47  ;;  %v616_v55 = vadd.f32 1.0, %v1133_v44  ;;  %v619_v56 = vmul.f32 -0.5, %v1133_v44  ;;  %v1795_v57 = vpop.eup %1138  ;;  %vm1797_vm6 = vcmp.lt.f32.partialorder %v640_v46, 0.0004427343 }
  0x7b   : > { %v639_v58 = vmul.f32 %v1129_v33, %v638_v50  ;;  %v629_v60 = vadd.f32 1.0, %v628_v51  ;;  %v622_v61 = vand.u32 2147483647, %v1133_v44  ;;  %v607_v0 = vadd.f32 1.0, %v1790_v48 }
  0x7c   : > { %v1141_v62 = vpop.eup %1140  ;;  %1148 = vlog2.f32 %v616_v55  ;;  %v620_v63 = vadd.f32 1.0, %v619_v56  ;;  %v610_v2 = vmul.f32 -0.5, %v1790_v48  ;;  %vm1804_vm8 = vcmp.lt.f32.partialorder %v631_v52, 0.0004427343  ;;  %v433_v52 = vld [vmem:[%s1718_s4 + $0x60] sm:$0xff] }
  0x7d   : > { %v1143_v4 = vpop.eup %1142  ;;  %v654_v6 = vmul.f32 0.6931472, %v1141_v62  ;;  %v630_v7 = vmul.f32 %v1131_v37, %v629_v60  ;;  %vm1808_vm9 = vcmp.lt.f32.partialorder %v622_v61, 0.0004427343  ;;  %1150 = vlog2.f32 %v607_v0  ;;  %v432_v62 = vld [vmem:[%s1718_s4 + $0x58] sm:$0xff] }
  0x7e   : > { %v1145_v11 = vpop.eup %1144  ;;  %v645_v14 = vmul.f32 0.6931472, %v1143_v4  ;;  %v611_v16 = vadd.f32 1.0, %v610_v2  ;;  %v613_v18 = vand.u32 2147483647, %v1790_v48  ;;  %v621_v24 = vmul.f32 %v1133_v44, %v620_v63  ;;  %v689_v44 = vld [vmem:[%s1726_s24 + $0x60] sm:$0xff] }
  0x7f   : > { %v660_v19 = vsel %vm1781_vm2, %v657_v49, %v654_v6  ;;  %v636_v22 = vmul.f32 0.6931472, %v1145_v11  ;;  %v598_v25 = vadd.f32 1.0, %v1793_v53  ;;  %v601_v34 = vmul.f32 -0.5, %v1793_v53  ;;  %v1843_v49 = vld [vmem:[%s1724_s26 + $0x28] sm:$0xff]  ;;  %v687_v63 = vld [vmem:[%s1726_s24 + $0x50] sm:$0xff] }
  0x80   : > { %v1147_v26 = vpop.eup %1146  ;;  %v676_v30 = vsel %vm468_vm0, %v1740_v1, %v660_v19  ;;  %v651_v31 = vsel %vm1786_vm4, %v648_v54, %v645_v14  ;;  %v612_v33 = vmul.f32 %v1790_v48, %v611_v16  ;;  %v688_v54 = vld [vmem:[%s1726_s24 + $0x58] sm:$0xff]  ;;  %vm1850_vm12 = vcmp.lt.f32.partialorder %v613_v18, 0.0004427343 }
  0x81   : > { %v708_v35 = vmul.f32 %v692_v13, %v676_v30  ;;  %v675_v37 = vsel %vm467_vm1, %v1744_v3, %v651_v31  ;;  %v642_v38 = vsel %vm1797_vm6, %v639_v58, %v636_v22  ;;  %v627_v39 = vmul.f32 0.6931472, %v1147_v26  ;;  %v1879_v22 = vld [vmem:[%s1724_s26 + $0x20] sm:$0xff]  ;;  %v1886_v26 = vld [vmem:[%s1724_s26 + $0x18] sm:$0xff]  ;;  %v430_v31 = vld [vmem:[%s1718_s4 + $0x48] sm:$0xff] }
  0x82   : > { %v1149_v1 = vpop.eup %1148  ;;  %v707_v41 = vmul.f32 %v691_v21, %v675_v37  ;;  %v674_v43 = vsel %vm466_vm3, %v1748_v5, %v642_v38  ;;  %1152 = vlog2.f32 %v598_v25  ;;  %v602_v45 = vadd.f32 1.0, %v601_v34 }
  0x83   : > { %v724_v46 = vadd.f32 %v708_v35, %v436_v29  ;;  %v706_v3 = vmul.f32 %v690_v32, %v674_v43  ;;  %v633_v47 = vsel %vm1804_vm8, %v630_v7, %v627_v39  ;;  %v618_v48 = vmul.f32 0.6931472, %v1149_v1  ;;  %v1151_v50 = vpop.eup %1150  ;;  %v1905_v39 = vld [vmem:[%s1724_s26 + $0x8] sm:$0xff] }
  0x84   : > { %v723_v51 = vadd.f32 %v707_v41, %v435_v36  ;;  %v673_v5 = vsel %vm465_vm5, %v1752_v8, %v633_v47  ;;  %v604_v56 = vand.u32 2147483647, %v1793_v53  ;;  %v609_v61 = vmul.f32 0.6931472, %v1151_v50  ;;  %v1898_v36 = vld [vmem:[%s1724_s26 + $0x10] sm:$0xff] }
  0x85   : > { %727 = vmatpush.msra.mxu0 %v724_v46  ;;  %v722_v58 = vadd.f32 %v706_v3, %v434_v42  ;;  %v705_v59 = vmul.f32 %v689_v44, %v673_v5  ;;  %v624_v60 = vsel %vm1808_vm9, %v621_v24, %v618_v48  ;;  %v589_v0 = vadd.f32 1.0, %v1795_v57  ;;  %v686_v24 = vld [vmem:[%s1726_s24 + $0x48] sm:$0xff]  ;;  %v1909_v42 = vld [vmem:[%s1724_s26] sm:$0xff] }
  0x86   : > { %v672_v8 = vsel %vm464_vm7, %v1756_v12, %v624_v60  ;;  %v592_v2 = vmul.f32 -0.5, %v1795_v57  ;;  %v474_v4 = vmin.f32 %v1843_v49, 20.0  ;;  %v615_v9 = vsel %vm1850_vm12, %v612_v33, %v609_v61  ;;  %v431_v12 = vld [vmem:[%s1718_s4 + $0x50] sm:$0xff]  ;;  %v685_v44 = vld [vmem:[%s1726_s24 + $0x40] sm:$0xff] }
  0x87   : > { %728 = vmatpush.msra.mxu0 %v723_v51  ;;  %v721_v6 = vadd.f32 %v705_v59, %v433_v52  ;;  %v704_v7 = vmul.f32 %v688_v54, %v672_v8  ;;  %v603_v10 = vmul.f32 %v1793_v53, %v602_v45  ;;  %v671_v13 = vsel %vm463_vm10, %v1760_v15, %v615_v9  ;;  %v429_v51 = vld [vmem:[%s1718_s4 + $0x40] sm:$0xff] }
  0x88   : > { %v1153_v11 = vpop.eup %1152  ;;  %vm1872_vm13 = vcmp.lt.f32.partialorder %v604_v56, 0.0004427343  ;;  %1154 = vlog2.f32 %v589_v0  ;;  %v499_v16 = vmul.f32 1.442695, %v476_v27  ;;  %v703_v19 = vmul.f32 %v687_v63, %v671_v13 }
  0x89   : > { %729 = vmatpush.msra.mxu0 %v722_v58  ;;  %v720_v18 = vadd.f32 %v704_v7, %v432_v62  ;;  %v600_v53 = vmul.f32 0.6931472, %v1153_v11  ;;  %v593_v21 = vadd.f32 1.0, %v592_v2  ;;  %v595_v25 = vand.u32 2147483647, %v1795_v57 }
  0x8a   : > { %1156 = vpow2.f32 %v499_v16  ;;  %v497_v15 = vmul.f32 1.442695, %v475_v40  ;;  %v719_v27 = vadd.f32 %v703_v19, %v431_v12  ;;  %v495_v30 = vmul.f32 1.442695, %v474_v4 }
  0x8b   : > { %730 = vmatpush.msra.mxu0 %v721_v6  ;;  %v606_v29 = vsel %vm1872_vm13, %v603_v10, %v600_v53  ;;  %v473_v33 = vmin.f32 %v1879_v22, 20.0  ;;  %v594_v34 = vmul.f32 %v1795_v57, %v593_v21  ;;  %v472_v35 = vmin.f32 %v1886_v26, 20.0 }
  0x8c   : > { %v670_v32 = vsel %vm462_vm11, %v1764_v17, %v606_v29  ;;  %1158 = vpow2.f32 %v497_v15  ;;  %vm1900_vm14 = vcmp.lt.f32.partialorder %v595_v25, 0.0004427343  ;;  %v471_v45 = vmin.f32 %v1898_v36, 20.0  ;;  %v684_v25 = vld [vmem:[%s1726_s24 + $0x38] sm:$0xff] }
  0x8d   : > { %731 = vmatpush.msra.mxu0 %v720_v18  ;;  %v702_v40 = vmul.f32 %v686_v24, %v670_v32  ;;  %1160 = vpow2.f32 %v495_v30  ;;  %v493_v17 = vmul.f32 1.442695, %v473_v33  ;;  %v491_v57 = vmul.f32 1.442695, %v472_v35 }
  0x8e   : > { %v1155_v37 = vpop.eup %1154  ;;  %v470_v48 = vmin.f32 %v1905_v39, 20.0  ;;  %v469_v54 = vmin.f32 %v1909_v42, 20.0  ;;  %vm460_vm0 = vcmp.gt.f32.partialorder %v1772_v23, 20.0  ;;  %v489_v62 = vmul.f32 1.442695, %v471_v45 }
  0x8f   : > { %732 = vmatpush.msra.mxu0 %v719_v27  ;;  %v718_v1 = vadd.f32 %v702_v40, %v430_v31  ;;  %v591_v41 = vmul.f32 0.6931472, %v1155_v37  ;;  %1162 = vpow2.f32 %v493_v17  ;;  %vm459_vm1 = vcmp.gt.f32.partialorder %v1776_v28, 20.0  ;;  %v428_v31 = vld [vmem:[%s1718_s4 + $0x38] sm:$0xff] }
  0x90   : > { %v1157_v43 = vpop.eup %1156  ;;  %1164 = vpow2.f32 %v491_v57  ;;  %v487_v0 = vmul.f32 1.442695, %v470_v48  ;;  %vm458_vm3 = vcmp.gt.f32.partialorder %v1843_v49, 20.0  ;;  %v485_v6 = vmul.f32 1.442695, %v469_v54  ;;  %v683_v57 = vld [vmem:[%s1726_s24 + $0x30] sm:$0xff] }
  0x91   : > { %733 = vmatpush.msra.mxu0 %v718_v1  ;;  %v597_v46 = vsel %vm1900_vm14, %v594_v34, %v591_v41  ;;  %v580_v3 = vadd.f32 1.0, %v1157_v43  ;;  %v583_v47 = vmul.f32 -0.5, %v1157_v43  ;;  %v586_v5 = vand.u32 2147483647, %v1157_v43 }
  0x92   : > { %v1159_v50 = vpop.eup %1158  ;;  %v669_v52 = vsel %vm461_vm15, %v1768_v20, %v597_v46  ;;  %vm457_vm4 = vcmp.gt.f32.partialorder %v1879_v22, 20.0  ;;  %vm456_vm9 = vcmp.gt.f32.partialorder %v1886_v26, 20.0  ;;  %vm455_vm11 = vcmp.gt.f32.partialorder %v1898_v36, 20.0 }
  0x93   : > { %v1161_v55 = vpop.eup %1160  ;;  %v701_v56 = vmul.f32 %v685_v44, %v669_v52  ;;  %1166 = vlog2.f32 %v580_v3  ;;  %v584_v58 = vadd.f32 1.0, %v583_v47  ;;  %v571_v59 = vadd.f32 1.0, %v1159_v50  ;;  %v682_v3 = vld [vmem:[%s1726_s24 + $0x28] sm:$0xff] }
  0x94   : > { %v574_v60 = vmul.f32 -0.5, %v1159_v50  ;;  %v562_v61 = vadd.f32 1.0, %v1161_v55  ;;  %v565_v63 = vmul.f32 -0.5, %v1161_v55  ;;  %vm1921_vm2 = vcmp.lt.f32.partialorder %v586_v5, 0.0004427343  ;;  %v427_v5 = vld [vmem:[%s1718_s4 + $0x30] sm:$0xff] }
  0x95   : > { %v717_v8 = vadd.f32 %v701_v56, %v429_v51  ;;  %v1163_v20 = vpop.eup %1162  ;;  %1168 = vlog2.f32 %v571_v59  ;;  %v577_v4 = vand.u32 2147483647, %v1159_v50  ;;  %v585_v7 = vmul.f32 %v1157_v43, %v584_v58 }
  0x96   : > { %v575_v9 = vadd.f32 1.0, %v574_v60  ;;  %1170 = vlog2.f32 %v562_v61  ;;  %v553_v10 = vadd.f32 1.0, %v1163_v20  ;;  %v1165_v11 = vpop.eup %1164  ;;  %v566_v12 = vadd.f32 1.0, %v565_v63  ;;  %v426_v60 = vld [vmem:[%s1718_s4 + $0x28] sm:$0xff] }
  0x97   : > { %734 = vmatpush.msra.mxu0 %v717_v8  ;;  %v568_v13 = vand.u32 2147483647, %v1161_v55  ;;  %v556_v14 = vmul.f32 -0.5, %v1163_v20  ;;  %1172 = vpow2.f32 %v489_v62  ;;  %v559_v18 = vand.u32 2147483647, %v1163_v20  ;;  %v681_v62 = vld [vmem:[%s1726_s24 + $0x20] sm:$0xff] }
  0x98   : > { %1174 = vlog2.f32 %v553_v10  ;;  %v544_v19 = vadd.f32 1.0, %v1165_v11  ;;  %v547_v53 = vmul.f32 -0.5, %v1165_v11  ;;  %v576_v15 = vmul.f32 %v1159_v50, %v575_v9 }
  0x99   : > { %v1167_v16 = vpop.eup %1166  ;;  %v557_v24 = vadd.f32 1.0, %v556_v14  ;;  %1176 = vpow2.f32 %v487_v0  ;;  %v550_v29 = vand.u32 2147483647, %v1165_v11  ;;  %vm1931_vm5 = vcmp.lt.f32.partialorder %v577_v4, 0.0004427343  ;;  %v425_v4 = vld [vmem:[%s1718_s4 + $0x20] sm:$0xff] }
  0x9a   : > { %v582_v21 = vmul.f32 0.6931472, %v1167_v16  ;;  %1178 = vlog2.f32 %v544_v19  ;;  %v548_v27 = vadd.f32 1.0, %v547_v53  ;;  %v567_v40 = vmul.f32 %v1161_v55, %v566_v12  ;;  %v424_v14 = vld [vmem:[%s1718_s4 + $0x18] sm:$0xff] }
  0x9b   : > { %v1169_v30 = vpop.eup %1168  ;;  %1180 = vpow2.f32 %v485_v6  ;;  %vm1938_vm6 = vcmp.lt.f32.partialorder %v568_v13, 0.0004427343  ;;  %vm1942_vm7 = vcmp.lt.f32.partialorder %v559_v18, 0.0004427343  ;;  %v558_v44 = vmul.f32 %v1163_v20, %v557_v24 }
  0x9c   : > { %v588_v32 = vsel %vm1921_vm2, %v585_v7, %v582_v21  ;;  %v1171_v34 = vpop.eup %1170  ;;  %v573_v37 = vmul.f32 0.6931472, %v1169_v30  ;;  %v549_v45 = vmul.f32 %v1165_v11, %v548_v27  ;;  %vm1950_vm8 = vcmp.lt.f32.partialorder %v550_v29, 0.0004427343 }
  0x9d   : > { %v668_v35 = vsel %vm460_vm0, %v1772_v23, %v588_v32  ;;  %v1173_v1 = vpop.eup %1172  ;;  %v564_v43 = vmul.f32 0.6931472, %v1171_v34  ;;  %vm454_vm13 = vcmp.gt.f32.partialorder %v1905_v39, 20.0  ;;  %vm453_vm15 = vcmp.gt.f32.partialorder %v1909_v42, 20.0 }
  0x9e   : > { %v700_v41 = vmul.f32 %v684_v25, %v668_v35  ;;  %v1175_v46 = vpop.eup %1174  ;;  %v579_v23 = vsel %vm1931_vm5, %v576_v15, %v573_v37  ;;  %v535_v48 = vadd.f32 1.0, %v1173_v1  ;;  %v538_v50 = vmul.f32 -0.5, %v1173_v1  ;;  %v423_v35 = vld [vmem:[%s1718_s4 + $0x10] sm:$0xff] }
  0x9f   : > { %v1177_v51 = vpop.eup %1176  ;;  %v667_v54 = vsel %vm459_vm1, %v1776_v28, %v579_v23  ;;  %v570_v55 = vsel %vm1938_vm6, %v567_v40, %v564_v43  ;;  %v555_v56 = vmul.f32 0.6931472, %v1175_v46  ;;  %v541_v7 = vand.u32 2147483647, %v1173_v1  ;;  %v422_v46 = vld [vmem:[%s1718_s4 + $0x8] sm:$0xff] }
  0xa0   : > { %v716_v52 = vadd.f32 %v700_v41, %v428_v31  ;;  %v1179_v58 = vpop.eup %1178  ;;  %v699_v59 = vmul.f32 %v683_v57, %v667_v54  ;;  %v666_v61 = vsel %vm458_vm3, %v1843_v49, %v570_v55  ;;  %1182 = vlog2.f32 %v535_v48  ;;  %v680_v49 = vld [vmem:[%s1726_s24 + $0x18] sm:$0xff]  ;;  %v679_v31 = vld [vmem:[%s1726_s24 + $0x10] sm:$0xff]  ;;  %v678_v57 = vld [vmem:[%s1726_s24 + $0x8] sm:$0xff] }
  0xa1   : > { %v539_v8 = vadd.f32 1.0, %v538_v50  ;;  %v1181_v63 = vpop.eup %1180  ;;  %v698_v28 = vmul.f32 %v682_v3, %v666_v61  ;;  %v561_v0 = vsel %vm1942_vm7, %v558_v44, %v555_v56  ;;  %v546_v20 = vmul.f32 0.6931472, %v1179_v58  ;;  %v421_v48 = vld [vmem:[%s1718_s4] sm:$0xff]  ;;  %v726_v54 = vld [vmem:[%s334_s11] sm:$0xff]  ;;  %v725_v55 = vld [vmem:[#allocation2] sm:$0xff] }
  0xa2   : > { %735 = vmatpush.msra.mxu0 %v716_v52  ;;  %v715_v2 = vadd.f32 %v699_v59, %v427_v5  ;;  %v665_v6 = vsel %vm457_vm4, %v1879_v22, %v561_v0  ;;  %v526_v9 = vadd.f32 1.0, %v1177_v51  ;;  %v529_v13 = vmul.f32 -0.5, %v1177_v51 }
  0xa3   : > { %v714_v10 = vadd.f32 %v698_v28, %v426_v60  ;;  %v697_v11 = vmul.f32 %v681_v62, %v665_v6  ;;  %v552_v12 = vsel %vm1950_vm8, %v549_v45, %v546_v20  ;;  %v540_v18 = vmul.f32 %v1173_v1, %v539_v8 }
  0xa4   : > { %736 = vmatpush.msra.mxu0 %v715_v2  ;;  %v664_v16 = vsel %vm456_vm9, %v1886_v26, %v552_v12  ;;  %1184 = vlog2.f32 %v526_v9  ;;  %v517_v19 = vadd.f32 1.0, %v1181_v63  ;;  %v530_v22 = vadd.f32 1.0, %v529_v13 }
  0xa5   : > { %v713_v53 = vadd.f32 %v697_v11, %v425_v4  ;;  %v696_v21 = vmul.f32 %v680_v49, %v664_v16  ;;  %v520_v24 = vmul.f32 -0.5, %v1181_v63  ;;  %vm1977_vm10 = vcmp.lt.f32.partialorder %v541_v7, 0.0004427343 }
  0xa6   : > { %v1183_v25 = vpop.eup %1182  ;;  %737 = vmatpush.msra.mxu0 %v714_v10  ;;  %v532_v27 = vand.u32 2147483647, %v1177_v51  ;;  %1186 = vlog2.f32 %v517_v19  ;;  %v523_v32 = vand.u32 2147483647, %v1181_v63  ;;  %v531_v40 = vmul.f32 %v1177_v51, %v530_v22 }
  0xa7   : > { %v712_v29 = vadd.f32 %v696_v21, %v424_v14  ;;  %v537_v26 = vmul.f32 0.6931472, %v1183_v25  ;;  %v521_v30 = vadd.f32 1.0, %v520_v24 }
  0xa8   : > { %738 = vmatpush.msra.mxu0 %v713_v53  ;;  %vm533_vm12 = vcmp.lt.f32.partialorder %v532_v27, 0.0004427343  ;;  %vm524_vm14 = vcmp.lt.f32.partialorder %v523_v32, 0.0004427343 }
  0xa9   : > { %v543_v33 = vsel %vm1977_vm10, %v540_v18, %v537_v26  ;;  %v522_v1 = vmul.f32 %v1181_v63, %v521_v30 }
  0xaa   : > { %v1185_v34 = vpop.eup %1184  ;;  %739 = vmatpush.msra.mxu0 %v712_v29  ;;  %v663_v37 = vsel %vm455_vm11, %v1898_v36, %v543_v33  ;;  %v677_v36 = vld [vmem:[%s1726_s24] sm:$0xff] }
  0xab   : > { %v695_v38 = vmul.f32 %v679_v31, %v663_v37  ;;  %v528_v17 = vmul.f32 0.6931472, %v1185_v34 }
  0xac   : > { %v1187_v41 = vpop.eup %1186 }
  0xad   : > { %v711_v43 = vadd.f32 %v695_v38, %v423_v35  ;;  %v534_v44 = vsel %vm533_vm12, %v531_v40, %v528_v17  ;;  %v519_v45 = vmul.f32 0.6931472, %v1187_v41 }
  0xae   : > { %v662_v23 = vsel %vm454_vm13, %v1905_v39, %v534_v44 }
  0xaf   : > { %740 = vmatpush.msra.mxu0 %v711_v43  ;;  %v694_v3 = vmul.f32 %v678_v57, %v662_v23  ;;  %v525_v47 = vsel %vm524_vm14, %v522_v1, %v519_v45 }
  0xb0   : > { %v661_v50 = vsel %vm453_vm15, %v1909_v42, %v525_v47 }
  0xb1   : > { %v710_v51 = vadd.f32 %v694_v3, %v422_v46  ;;  %v693_v52 = vmul.f32 %v677_v36, %v661_v50 }
  0xb3   : > { %741 = vmatpush.msra.mxu0 %v710_v51  ;;  %v709_v5 = vadd.f32 %v693_v52, %v421_v48 }
  0xb5   : > { %742 = vmatpush.msra.mxu0 %v709_v5 }
  0xb6   : > { %743 = vmatmul.f32.vlgmr.msra.gmra.mxu0 %v726_v54 }
 0x132   : > { %752 = sbr.rel (%p972_p7) target bundleno = 321 (0x141), region = 64 }
 0x133   : > { %v744_v56 = vpop.f32.mrf.mxu0 }
 0x134   : > { %v747_v58 = vadd.f32 %v744_v56, %v725_v55 }
 0x136   : > { %748 = vst [vmem:[#allocation2] sm:$0xff] %v747_v58 }
 0x137   : > { %v1188_v42 = vld [vmem:[%s2159_s28] ss:$0 sm:$0xff] }
 0x13d   : > { %v753_v39 = vld [vmem:[#allocation2] sm:$0xff] }
 0x13e   : > { %v758_v59 = vadd.f32 %v1188_v42, %v753_v39 }
 0x140   : > { %759 = vst [vmem:[%s409_s5] sm:$0xff] %v758_v59 }
 0x141 PF: > { %s2160_s29 = sld [smem:[#allocation20_spill]]  ;;  %s774_s14 = sshll.u32 %s409_s5, 4  ;;  %s775_s14 = int_to_ptr.vmem [resolvable:$true] %s774_s14 }
 0x142   : > { %s2161_s9 = sld [smem:[#allocation32_spill]]  ;;  %s761_s16 = scalar_lea.sflag [#allocation5], %s407_s7 }
 0x147   : > { %s974_s12 = sshll.u32 %s2160_s29, 3 }
 0x148   : > { %s772_s1 = scalar_lea.hbm %s2161_s9, %s974_s12  ;;  %s1329_s24 = scalar_lea.hbm %s2161_s9, 16 }
 0x149   : > { %s776_s8 = sshll.u32 %s772_s1, 4  ;;  %s777_s8 = int_to_ptr.hbm [resolvable:$true] %s776_s8 }
 0x14a   : > { %s1323_s21 = sshra.s32 %s777_s8, 4  ;;  %s1324_s21 = int_to_ptr.hbm [resolvable:$true] %s1323_s21 }
 0x14b   : > { %s1325_s4 = scalar_lea.hbm %s1324_s21, 8  ;;  %p1330_p8 = scmp.lt.s32.totalorder %s1324_s21, %s2161_s9 }
 0x14c   : > { %p1326_p11 = scmp.ne.s32.totalorder %s1324_s21, %s1325_s4  ;;  %p1331_p9 = scmp.lt.s32.totalorder %s1329_s24, %s1325_s4 }
 0x14e   : > { %p1327_p5 = pnand %p1326_p11, %p1666_p3  ;;  %p1332_p10 = por %p1331_p9, %p1330_p8 }
 0x150   : > { %p1328_p0 = pneg %p1327_p5 }
 0x152   : > { %p1333_p12 = pnand %p1332_p10, %p1328_p0 }
 0x154   : > { %1336 = shalt.err (!%p1333_p12)
}
 0x155   : > { %988 = dma.vmem_to_hbm [thread:$0]  (%p1666_p3), %s775_s14, 128, %s777_s8, %s761_s16  }
 0x156 PF: > { %p1008_p13 = scmp.ge.s32.totalorder %s1463_s6, 2  ;;  %s788_s17 = sand.u32 1, %s1411_s18  }
 0x157   : > { %s789_s5 = scalar_lea.sflag [#allocation5], %s788_s17 }
 0x158   : > { %p1004_p1 = pnand %p1008_p13, %p1670_p2 }
 0x15a   : > { %p1005_p6 = pneg %p1004_p1 }
 0x15c   : > { %1406 = dma.done.wait (%p1005_p6), %s789_s5, 128  }
 0x15d   : > { %1408 = vsyncadd (%p1005_p6), %s789_s5, 4294967168  ;;  %s27_s6 = sadd.s32 1, %s1463_s6   ;;  %s2164_s15 = sld [smem:[#allocation16_spill]] }
 0x15e   : > { %p2026_p4 = scmp.ge.s32.totalorder %s27_s6, 6   ;;  %s2165_s20 = sld [smem:[#allocation28_spill]] }
 0x15f   : > { %s2166_s21 = sld [smem:[#allocation17_spill]]  ;;  %s2175_s18 = smov %s1415_s19 }
 0x160   : > { %s2167_s30 = sld [smem:[#allocation26_spill]]  ;;  %s2177_s22 = smov %s1431_s23 }
 0x161   : > { %s2168_s28 = sld [smem:[#allocation18_spill]]  ;;  %s2179_s24 = smov %s1439_s25 }
 0x162   : > { %s2169_s26 = sld [smem:[#allocation27_spill]] }
 0x163   : > { %s2170_s29 = sld [smem:[#allocation21_spill]]  ;;  %s2176_s19 = smov %s2164_s15 }
 0x164   : > { %s2171_s12 = sld [smem:[#allocation22_spill]] }
 0x165   : > { %s2172_s10 = sld [smem:[#allocation23_spill]] }
 0x166   : > { %s2173_s11 = sld [smem:[#allocation24_spill]]  ;;  %s2178_s23 = smov %s2167_s30 }
 0x167   : > { %s2180_s25 = smov %s2168_s28 }
 0x168   :  { %26 = sbr.rel (!%p2026_p4) target bundleno = 18 (0x12), region = 133 }
 0x169   : > { %s2181_s27 = smov %s2170_s29 }
 0x16a   : > { %s2182_s28 = smov %s2171_s12 }
 0x16b   : > { %s2183_s29 = smov %s2172_s10 }
 0x16c   : > { %s2184_s30 = smov %s2173_s11 }
 0x16d   :  { %795 = vsyncpa [#allocation4], 1 }
 0x16e   :  { %797 = vsyncpa [#allocation4 + $0x1], 1 }
 0x16f   :  { %798 = vsyncpa [#allocation7], 1 }
 0x170   :  { %800 = vsyncpa [#allocation7 + $0x1], 1 }
 0x171   :  { %801 = vsyncpa [#allocation10], 1 }
 0x172   :  { %803 = vsyncpa [#allocation10 + $0x1], 1 }
 0x173   :  { %804 = vsyncpa [#allocation5], 1 }
 0x174   :  { %806 = vsyncpa [#allocation5 + $0x1], 1 }

</bundles_post_ra>
